<compile_context>
chip_gen: v6e
topology: v6e:2x2x1
jax: 0.10.0
libtpu: 0.0.40
codegen_flags: <defaults>
</compile_context>

<pallas_src>
import functools

import jax
import jax.numpy as jnp
from jax.experimental import pallas as pl
from jax.experimental.pallas import tpu as pltpu


def _round_up(x: int, m: int) -> int:
    return ((x + m - 1) // m) * m


def _vmem_capacity_bytes() -> int:
    """Per-core VMEM capacity; conservative (v7x) fallback if the query fails."""
    try:
        return int(pltpu.get_tpu_info().vmem_capacity_bytes)
    except Exception:
        return 64 * 2**20


def _head_config(M, K, N, dtype, tm_target=1024):
    """Pick tiles for the fused (untiled-K) path; fall back to K tiling only when
    the VMEM-resident weight / x tile cannot fit the per-generation budget."""
    itemsize = jnp.dtype(dtype).itemsize
    sublane = 16 if jnp.dtype(dtype) == jnp.dtype(jnp.bfloat16) else 8
    n_pad = _round_up(N, 128)  # lane-dense output (unmasked vst)

    cap = _vmem_capacity_bytes()
    budget = int(cap * 0.45)   # headroom for Mosaic internal scratch / semaphores

    # --- M tile ---
    tm = min(tm_target, _round_up(M, sublane))
    # v7x has 2 TensorCores and the M axis is "parallel": make sure there are >=2
    # M tiles when the shape allows it (no effect on v5e/v6e correctness/perf).
    if pl.cdiv(M, tm) < 2 and tm >= 2 * sublane:
        tm = _round_up(pl.cdiv(tm, 2), sublane)

    def fused_footprint(tm_):
        # double-buffered x + weight + out tiles (conservative for the weight,
        # which is only fetched once thanks to the constant index_map)
        return 2 * itemsize * (tm_ * K + K * n_pad + tm_ * n_pad)

    # Shrink tm until the untiled-K footprint fits the budget.
    while fused_footprint(tm) > budget and tm > sublane:
        tm = max(sublane, _round_up(tm // 2, sublane))

    if fused_footprint(tm) <= budget:
        tk = K                          # single K step: weight stays VMEM-resident
        k_pad = K
    else:
        # Very large K (f32 K >~ 16-32k): stream K tiles with an f32 accumulator.
        tk = 2048
        while (2 * itemsize * (tm * tk + tk * n_pad + tm * n_pad)
               + 4 * tm * n_pad) > budget and tk > 128:
            tk //= 2
        k_pad = _round_up(K, tk)

    m_pad = _round_up(M, tm)
    return tm, tk, m_pad, k_pad, n_pad, cap


def head_kernel(x_ref, w_ref, o_ref):
    """Fused ReLU -> MXU matmul, one (tm, N_pad) output tile, single K step."""
    x = jnp.maximum(x_ref[...], jnp.zeros((), dtype=x_ref.dtype))   # ReLU
    o_ref[...] = jnp.dot(
        x, w_ref[...], preferred_element_type=jnp.float32
    ).astype(o_ref.dtype)


def head_kernel_ktiled(x_ref, w_ref, o_ref, acc_ref):
    """Fallback for very large K: f32-accumulated over the K grid axis."""
    k = pl.program_id(1)

    @pl.when(k == 0)
    def _():
        acc_ref[...] = jnp.zeros_like(acc_ref)

    x = jnp.maximum(x_ref[...], jnp.zeros((), dtype=x_ref.dtype))
    acc_ref[...] += jnp.dot(x, w_ref[...], preferred_element_type=jnp.float32)

    @pl.when(k == pl.num_programs(1) - 1)
    def _():
        o_ref[...] = acc_ref[...].astype(o_ref.dtype)


def prepare_head_weight(weight, dtype=None):
    """One-time (parameter-load time) transpose + lane pad of the PyTorch [N, K]
    weight into lane-dense [K, N_pad]; no K padding (K stays the exact full dim).
    Pass dtype=jnp.bfloat16 together with bf16 activations to halve HBM reads."""
    N, K = weight.shape
    dtype = weight.dtype if dtype is None else dtype
    n_pad = _round_up(N, 128)
    return jnp.pad(weight.T.astype(dtype), ((0, 0), (0, n_pad - N)))


@functools.partial(jax.jit, static_argnames=("out_features",))
def head_forward(x, w_prepared, out_features):
    """x: [B, S, in_features]; w_prepared: [K, N_pad] from prepare_head_weight."""
    B, S, K = x.shape
    M = B * S
    N = out_features
    dtype = x.dtype
    itemsize = jnp.dtype(dtype).itemsize

    tm, tk, m_pad, k_pad, n_pad, cap = _head_config(M, K, N, dtype)
    assert w_prepared.shape == (K, n_pad), "weight prepared with mismatched N_pad"
    # Pin both operands to one dtype (avoid silent mixed-precision drift).
    w_prepared = w_prepared.astype(dtype)

    x2d = x.reshape(M, K)
    if m_pad != M:
        # Only the ragged-M case pays for a pad copy; K is never padded on the
        # fused path, so no extra HBM read+write of x in the common case.
        x2d = jnp.pad(x2d, ((0, m_pad - M), (0, 0)))

    grid_m = m_pad // tm
    w_restream = 1 if tk == K else grid_m
    cost = pl.CostEstimate(
        flops=2 * M * K * N,                       # true N, not N_pad
        transcendentals=0,
        bytes_accessed=(m_pad * k_pad * itemsize
                        + w_restream * k_pad * n_pad * itemsize
                        + m_pad * n_pad * itemsize),
    )

    if tk == K:
        # --- Fused path: single K step, weight fetched once and VMEM-resident.
        footprint = 2 * itemsize * (tm * K + K * n_pad + tm * n_pad)
        vmem_limit = int(min(0.9 * cap, max(2 * footprint, 32 * 2**20)))
        out2d = pl.pallas_call(
            head_kernel,
            out_shape=jax.ShapeDtypeStruct((m_pad, n_pad), dtype),
            grid_spec=pltpu.PrefetchScalarGridSpec(
                num_scalar_prefetch=0,
                grid=(grid_m,),
                in_specs=[
                    pl.BlockSpec((tm, K), lambda i: (i, 0)),
                    pl.BlockSpec((K, n_pad), lambda i: (0, 0)),   # constant: one DMA
                ],
                out_specs=pl.BlockSpec((tm, n_pad), lambda i: (i, 0)),
            ),
            compiler_params=pltpu.CompilerParams(
                dimension_semantics=("parallel",),   # M tiles shard across v7x's 2 TCs
                vmem_limit_bytes=vmem_limit,
            ),
            cost_estimate=cost,
        )(x2d, w_prepared)
    else:
        # --- Huge-K fallback: K-tiled with an f32 accumulator.
        if k_pad != K:
            x2d = jnp.pad(x2d, ((0, 0), (0, k_pad - K)))
            w_prepared = jnp.pad(w_prepared, ((0, k_pad - K), (0, 0)))
        footprint = (2 * itemsize * (tm * tk + tk * n_pad + tm * n_pad)
                     + 4 * tm * n_pad)
        vmem_limit = int(min(0.9 * cap, max(2 * footprint, 32 * 2**20)))
        out2d = pl.pallas_call(
            head_kernel_ktiled,
            out_shape=jax.ShapeDtypeStruct((m_pad, n_pad), dtype),
            grid_spec=pltpu.PrefetchScalarGridSpec(
                num_scalar_prefetch=0,
                grid=(grid_m, k_pad // tk),
                in_specs=[
                    pl.BlockSpec((tm, tk), lambda i, k: (i, k)),
                    pl.BlockSpec((tk, n_pad), lambda i, k: (k, 0)),
                ],
                out_specs=pl.BlockSpec((tm, n_pad), lambda i, k: (i, 0)),
                scratch_shapes=[pltpu.VMEM((tm, n_pad), jnp.float32)],
            ),
            compiler_params=pltpu.CompilerParams(
                dimension_semantics=("parallel", "arbitrary"),
                vmem_limit_bytes=vmem_limit,
            ),
            cost_estimate=cost,
        )(x2d, w_prepared)

    out = out2d[:M, :N].reshape(B, S, N)
    if S == 1:                      # torch.squeeze(x, 1): only drops a size-1 dim
        out = out[:, 0, :]
    return out


def backbone(x):
    # Placeholder for the injected Backbone module (identity).
    return x


if __name__ == "__main__":
    B, S = 2, 1
    in_features, out_features = 32, 8

    key = jax.random.PRNGKey(0)
    kx, kw = jax.random.split(key)
    x = jax.random.normal(kx, (B, S, in_features), dtype=jnp.float32)
    weight = jax.random.normal(kw, (out_features, in_features), dtype=jnp.float32) * 0.1

    feats = backbone(x)
    # One-time weight prep (parameter-load time), then the fused jitted forward.
    w_prepared = prepare_head_weight(weight)
    out = head_forward(feats, w_prepared, out_features)
    out = jax.block_until_ready(out)

    # Reference check (plain JAX) — same semantics as the PyTorch forward.
    ref = jnp.squeeze(jnp.maximum(feats, 0.0) @ weight.T, axis=1)
    assert out.shape == (B, out_features)
    assert jnp.allclose(out, ref, atol=1e-5, rtol=1e-5)

    print("KERNEL_OK")
</pallas_src>

<mosaic_0001>
module attributes {stable_mosaic.version = 11 : i64} {
  func.func @head_kernel(%arg0: i32, %arg1: memref<8x32xf32, #tpu.memory_space<vmem>>, %arg2: memref<32x128xf32, #tpu.memory_space<vmem>>, %arg3: memref<8x128xf32, #tpu.memory_space<vmem>>) attributes {dimension_semantics = [#tpu.dimension_semantics<parallel>], iteration_bounds = array<i64: 1>, scalar_prefetch = 0 : i64, scratch_operands = 0 : i64, tpu.core_type = #tpu.core_type<tc>, window_params = [{transform_indices = @transform_0, window_bounds = array<i64: 8, 32>}, {pipeline_mode = #tpu.pipeline_mode<synchronous>, transform_indices = @transform_1, window_bounds = array<i64: 32, 128>}, {transform_indices = @transform_2, window_bounds = array<i64: 8, 128>}]} {
    %c0 = arith.constant 0 : index
    %c0_0 = arith.constant 0 : index
    %0 = vector.load %arg1[%c0, %c0_0] : memref<8x32xf32, #tpu.memory_space<vmem>>, vector<8x32xf32>
    %cst = arith.constant 0.000000e+00 : f32
    %1 = vector.broadcast %cst : f32 to vector<8x32xf32>
    %2 = arith.maximumf %0, %1 : vector<8x32xf32>
    %c0_1 = arith.constant 0 : index
    %c0_2 = arith.constant 0 : index
    %3 = vector.load %arg2[%c0_1, %c0_2] : memref<32x128xf32, #tpu.memory_space<vmem>>, vector<32x128xf32>
    %cst_3 = arith.constant dense<0.000000e+00> : vector<8x128xf32>
    %4 = tpu.matmul %2, %3, %cst_3 {dimension_numbers = #tpu.dot_dimension_numbers<[1], [0], [0], [1], [0, 0, 1, 1], [], []>} : vector<8x32xf32>, vector<32x128xf32>, vector<8x128xf32> -> vector<8x128xf32>
    %c0_4 = arith.constant 0 : index
    %c0_5 = arith.constant 0 : index
    %5 = vector.load %arg3[%c0_4, %c0_5] : memref<8x128xf32, #tpu.memory_space<vmem>>, vector<8x128xf32>
    tpu.vector_store %arg3[%c0_4, %c0_5], %4 {strides = array<i32>} : memref<8x128xf32, #tpu.memory_space<vmem>>, vector<8x128xf32>,
    return
  }
  func.func @transform_0(%arg0: i32) -> (i32, i32) {
    %c0_i32 = arith.constant 0 : i32
    %c0_i32_0 = arith.constant 0 : i32
    return %arg0, %c0_i32 : i32, i32
  }
  func.func @transform_1(%arg0: i32) -> (i32, i32) {
    %c0_i32 = arith.constant 0 : i32
    %c0_i32_0 = arith.constant 0 : i32
    %c0_i32_1 = arith.constant 0 : i32
    return %c0_i32, %c0_i32_0 : i32, i32
  }
  func.func @transform_2(%arg0: i32) -> (i32, i32) {
    %c0_i32 = arith.constant 0 : i32
    %c0_i32_0 = arith.constant 0 : i32
    return %arg0, %c0_i32 : i32, i32
  }
}

</mosaic_0001>

<bundles_post_ra>
// kernel: head_forward.1
= control target key start
LH: loop header
LB: loop body
LE: loop exit
PB: predicated region body
PF: predicated region fallthrough
CT: control target
= control target key end

     0   :  { %7 = vsyncpa [#allocation3], 0  ;;  %s155_s9 = smov [#allocation2]   ;;  %s184_s0 = inlined_call_operand.vmem [shape: f32[8,32], index: 0, kind: input, shape index: {}]   ;;  %s185_s1 = inlined_call_operand.hbm [shape: f32[32,128], index: 1, kind: input, shape index: {}]   ;;  %s186_s2 = inlined_call_operand.vmem [shape: f32[8,128], index: 2, kind: output, shape index: {}]  }
   0x1   :  { %s15_s10 = sshll.u32 %s155_s9, 4  ;;  %s16_s10 = int_to_ptr.vmem [resolvable:$true] %s15_s10 }
   0x2   :  { %s141_s11 = scalar_lea.vmem %s16_s10, 512  ;;  %p146_p1 = scmp.lt.s32.totalorder %s16_s10, %s16_s10 }
   0x3   :  { %p142_p0 = scmp.ne.s32.totalorder %s16_s10, %s141_s11  ;;  %p147_p2 = scmp.lt.s32.totalorder %s141_s11, %s141_s11 }
   0x5   :  { %p148_p3 = por %p147_p2, %p146_p1 }
   0x7   :  { %p149_p4 = pnand %p148_p3, %p142_p0 }
   0x9   :  { %152 = shalt.err (!%p149_p4)
}
   0xa   :  { %s156_s12 = smov 128   ;;  %s157_s13 = smov 8  }
   0xb   :  { %21 = dma.hbm_to_vmem [thread:$0]  %s185_s1, 512, %s16_s10, [#allocation3], %s156_s12, %s156_s12, %s157_s13  }
   0xc   :  { %153 = dma.done.wait [#allocation3], 512  }
   0xd   :  { %154 = vsyncadd [#allocation3], 4294966784  ;;  %v158_v0 = vmov 0.0   ;;  %vm159_vm0 = vmmov 0   ;;  %v30_v1 = vld [vmem:[#allocation2 + $0x18] sm:$0xff]  ;;  %v29_v2 = vld [vmem:[#allocation2 + $0x10] sm:$0xff] }
   0xe   :  { %117 = vmatprep.subr.mxu0 %v158_v0  ;;  %125 = vmatprep.mubr.msk.f32.mxu0 %vm159_vm0, %v158_v0  ;;  %v25_v3 = vld [vmem:[%s184_s0] sm:$0xff]  ;;  %v28_v4 = vld [vmem:[#allocation2 + $0x8] sm:$0xff]  ;;  %vm31_vm1 = vcmask 261120  }
   0xf   :  { %118 = vmatpush3.msra.mxu0 %v30_v1  ;;  %v27_v5 = vld [vmem:[#allocation2] sm:$0xff]  ;;  %v26_v6 = vmax.f32 %v25_v3, 0.0 }
  0x10   :  { %119 = vmatprep.subr.mxu0 %v158_v0 }
  0x11   :  { %120 = vmatpush3.msra.mxu0 %v29_v2 }
  0x12   :  { %121 = vmatprep.subr.mxu0 %v158_v0 }
  0x13   :  { %122 = vmatpush3.msra.mxu0 %v28_v4 }
  0x14   :  { %123 = vmatprep.subr.mxu0 %v158_v0 }
  0x15   :  { %124 = vmatpush3.msra.mxu0 %v27_v5 }
  0x16   :  { %126 = vmatmul.mubr.msk.f32.vlgmr.msra.gmra.mxu0 %vm31_vm1, %v26_v6 }
  0xd6   :  { %v101_v7 = vpop.f32.mrf.mxu0 }
  0xd7   :  { %105 = vst [vmem:[%s186_s2] sm:$0xff] %v101_v7 }
  0xd8   :  { %v127_v8 = vpop.f32.mrf.mxu0 }
  0xd9   :  { %110 = vsyncpa [#allocation3], 1 }

</bundles_post_ra>
